<compile_context>
chip_gen: v7x
topology: tpu7x:2x2x1
jax: 0.10.0
libtpu: 0.0.40
codegen_flags: <defaults>
</compile_context>

<pallas_src>
import jax
import jax.numpy as jnp
from jax.experimental import pallas as pl
from jax.experimental.pallas import tpu as pltpu


LEAKY_SLOPE = 0.01  # F.leaky_relu default negative_slope
_LANE = 128
_VMEM_BUDGET = 40 * 1024 * 1024   # conservative live-bytes cap (v7x: 64 MiB physical)


def _round_up(x, m):
    return ((x + m - 1) // m) * m


def _full_spec(shape):
    n = len(shape)
    return pl.BlockSpec(shape, lambda *args, _n=n: (0,) * _n)


def _vmem_bytes(tb, S, sd, ad, d_pad, out_pad, num_shared):
    """Rough live-VMEM estimate for one grid step (double-buffered I/O + weights)."""
    f = 4  # f32
    stream = 2 * tb * (S * sd + ad) * f                      # state + action buffers
    outbuf = 2 * tb * out_pad * f                            # output buffers
    weights = 2 * ((sd + ad + 1) * 3 * d_pad                 # fused QKV (+bias)
                   + num_shared * (d_pad * d_pad + d_pad)    # stacked shared MLP
                   + (d_pad + 1) * out_pad) * f              # fused decoder
    interm = tb * (S * 3 * d_pad + S * S + 2 * d_pad) * f    # qkv, scores, h
    return stream + outbuf + weights + interm


def _make_kernel(num_shared, d_pad, attention_dim):
    """Kernel over a block of TB batch elements."""
    scale = 1.0 / (float(attention_dim) ** 0.5)  # PyTorch uses key.size(-1)

    def kernel(state_ref, action_ref, wqkv_s_ref, wqkv_a_ref, bqkv_ref,
               wsh_ref, bsh_ref, wpv_ref, bpv_ref, out_ref):
        tb, s, sd = state_ref.shape
        st = state_ref[...]                       # (TB, S, sd)
        act = action_ref[...]                     # (TB, ad)

        # ---- fused Q|K|V projection --------------------------------------
        # x = cat(state, action) @ Wqkv == state @ Wqkv[:sd] + action @ Wqkv[sd:]
        # (action broadcast over S happens here, never in HBM).
        qkv_s = jnp.dot(st.reshape(tb * s, sd), wqkv_s_ref[...],
                        preferred_element_type=jnp.float32)            # (TB*S, 3*D)
        qkv_a = jnp.dot(act, wqkv_a_ref[...],
                        preferred_element_type=jnp.float32) + bqkv_ref[...]  # (TB, 3*D)
        qkv = qkv_s.reshape(tb, s, 3 * d_pad) + qkv_a[:, None, :]       # (TB, S, 3*D)

        q = qkv[:, :, 0 * d_pad:1 * d_pad]        # 128-lane aligned slices
        k = qkv[:, :, 1 * d_pad:2 * d_pad]
        v = qkv[:, :, 2 * d_pad:3 * d_pad]

        # ---- attention scores + exact softmax ------------------------------
        scores = jnp.einsum("bqa,bka->bqk", q, k,
                            preferred_element_type=jnp.float32) * scale  # (TB, S, S)
        scores = scores - jnp.max(scores, axis=-1, keepdims=True)
        e = jnp.exp(scores)
        weights = e / jnp.sum(e, axis=-1, keepdims=True)

        # ---- fused (attention @ V) + sequence-mean --------------------------
        # mean over q commutes with the V contraction:
        #   mean_q(weights @ v) == (mean_q weights) @ v
        # -> VPU multiply + XLU sublane reduce instead of TB tiny MXU matmuls.
        wbar = jnp.mean(weights, axis=1)                                 # (TB, S)
        h = jnp.sum(wbar[:, :, None] * v, axis=1)                        # (TB, D)

        # ---- shared MLP with leaky_relu (stacked weights) -------------------
        for i in range(num_shared):
            h = jnp.dot(h, wsh_ref[i], preferred_element_type=jnp.float32) + bsh_ref[i]
            h = jnp.where(h > 0, h, LEAKY_SLOPE * h)

        # ---- fused price|volume decoder (lane-dense 128-wide output) --------
        out_ref[...] = (jnp.dot(h, wpv_ref[...], preferred_element_type=jnp.float32)
                        + bpv_ref[...])                                  # (TB, out_pad)

    return kernel


def _pack_params(params, attention_dim, hidden_dim, state_dim):
    """Fuse Q/K/V and decoder heads; zero-pad all feature dims to lane multiples."""
    d_pad = max(_round_up(attention_dim, _LANE), _round_up(hidden_dim, _LANE))
    sd = state_dim

    def pad_cols(w, n):
        return jnp.pad(w, ((0, 0), (0, n - w.shape[1])))

    wq, wk, wv = params["wq"], params["wk"], params["wv"]
    bq, bk, bv = params["bq"], params["bk"], params["bv"]

    wqkv_s = jnp.concatenate([pad_cols(wq[:sd], d_pad),
                              pad_cols(wk[:sd], d_pad),
                              pad_cols(wv[:sd], d_pad)], axis=1)         # (sd, 3*D)
    wqkv_a = jnp.concatenate([pad_cols(wq[sd:], d_pad),
                              pad_cols(wk[sd:], d_pad),
                              pad_cols(wv[sd:], d_pad)], axis=1)         # (ad, 3*D)
    bqkv = jnp.concatenate([pad_cols(bq, d_pad),
                            pad_cols(bk, d_pad),
                            pad_cols(bv, d_pad)], axis=1)                # (1, 3*D)

    # Stack all shared layers into one weight / one bias array.
    ws, bs = [], []
    for (w, b) in params["shared"]:
        ws.append(jnp.pad(w, ((0, d_pad - w.shape[0]), (0, d_pad - w.shape[1]))))
        bs.append(pad_cols(b, d_pad))
    wsh = jnp.stack(ws, axis=0)                                           # (L, D, D)
    bsh = jnp.stack(bs, axis=0)                                           # (L, 1, D)

    P = params["wp"].shape[1]
    V = params["wvol"].shape[1]
    out_pad = _round_up(P + V, _LANE)
    wpv = jnp.concatenate([params["wp"], params["wvol"]], axis=1)         # (hidden, P+V)
    wpv = jnp.pad(wpv, ((0, d_pad - wpv.shape[0]), (0, out_pad - (P + V))))  # (D, out_pad)
    bpv = jnp.pad(jnp.concatenate([params["bp"], params["bvol"]], axis=1),
                  ((0, 0), (0, out_pad - (P + V))))                       # (1, out_pad)

    return dict(wqkv_s=wqkv_s, wqkv_a=wqkv_a, bqkv=bqkv,
                wsh=wsh, bsh=bsh, wpv=wpv, bpv=bpv,
                d_pad=d_pad, out_pad=out_pad)


def multi_task_decoder_with_attention(state, action, params, *, block_b=256):
    """Forward pass. `params` is a dict of JAX arrays (see `init_params`)."""
    state = state.astype(jnp.float32)
    action = action.astype(jnp.float32)
    B, S, sd = state.shape
    ad = action.shape[-1]

    attention_dim = params["wq"].shape[1]
    hidden_dim = params["shared"][0][0].shape[1]
    P = params["wp"].shape[1]
    V = params["wvol"].shape[1]

    packed = _pack_params(params, attention_dim, hidden_dim, sd)
    d_pad = packed["d_pad"]
    out_pad = packed["out_pad"]
    num_shared = len(params["shared"])

    # ---- batch tiling ----------------------------------------------------
    # grid_b >= 2 whenever B > 8 so the "parallel" axis can shard across both
    # v7x TensorCores; TB capped by an explicit VMEM budget (v7x: 64 MiB).
    if B <= 8:
        tb = B
    else:
        tb = min(block_b, _round_up(pl.cdiv(B, 2), 8))
        tb = max(8, (tb // 8) * 8)
        while tb > 8 and _vmem_bytes(tb, S, sd, ad, d_pad, out_pad, num_shared) > _VMEM_BUDGET:
            tb = max(8, tb // 2)
    grid_b = pl.cdiv(B, tb)
    b_pad = grid_b * tb
    if b_pad != B:
        state = jnp.pad(state, ((0, b_pad - B), (0, 0), (0, 0)))
        action = jnp.pad(action, ((0, b_pad - B), (0, 0)))

    flat = [packed["wqkv_s"], packed["wqkv_a"], packed["bqkv"],
            packed["wsh"], packed["bsh"], packed["wpv"], packed["bpv"]]

    # TODO(synk): if an xprof trace on v5e shows exposed state DMA, add
    # pipeline_mode=pl.Buffered(3) to the state BlockSpec below.
    in_specs = [pl.BlockSpec((tb, S, sd), lambda b: (b, 0, 0)),
                pl.BlockSpec((tb, ad), lambda b: (b, 0))]
    in_specs += [_full_spec(p.shape) for p in flat]

    budget = _vmem_bytes(tb, S, sd, ad, d_pad, out_pad, num_shared)
    vmem_limit = int(min(48 << 20, max(32 << 20, 2 * budget)))

    out = pl.pallas_call(
        _make_kernel(num_shared, d_pad, attention_dim),
        out_shape=jax.ShapeDtypeStruct((b_pad, out_pad), jnp.float32),
        grid=(grid_b,),
        in_specs=in_specs,
        out_specs=pl.BlockSpec((tb, out_pad), lambda b: (b, 0)),
        compiler_params=pltpu.CompilerParams(
            dimension_semantics=("parallel",),
            vmem_limit_bytes=vmem_limit),
    )(state, action, *flat)

    return out[:B, :P + V]  # (B, P+V)


def init_params(key, state_dim, action_dim, hidden_dim, num_layers,
                output_dims, attention_dim):
    """Deterministic synthetic parameters (weights stored as (in, out))."""
    D = state_dim + action_dim
    keys = iter(jax.random.split(key, 32))

    def lin(kin, kout):
        kw = next(keys)
        kb = next(keys)
        bound = 1.0 / (kin ** 0.5)
        w = jax.random.uniform(kw, (kin, kout), jnp.float32, -bound, bound)
        b = jax.random.uniform(kb, (1, kout), jnp.float32, -bound, bound)
        return w, b

    wq, bq = lin(D, attention_dim)
    wk, bk = lin(D, attention_dim)
    wv, bv = lin(D, attention_dim)

    shared = [lin(attention_dim, hidden_dim)]
    for _ in range(num_layers - 2):
        shared.append(lin(hidden_dim, hidden_dim))

    wp, bp = lin(hidden_dim, output_dims["price"])
    wvol, bvol = lin(hidden_dim, output_dims["volume"])

    return dict(wq=wq, bq=bq, wk=wk, bk=bk, wv=wv, bv=bv,
                shared=shared, wp=wp, bp=bp, wvol=wvol, bvol=bvol)


def _reference(state, action, params):
    """Pure-JAX reference mirroring the PyTorch forward, for verification."""
    B, S, _ = state.shape
    if action.ndim == 2:
        action = jnp.broadcast_to(action[:, None, :], (B, S, action.shape[-1]))
    x = jnp.concatenate([state, action], axis=-1)
    q = x @ params["wq"] + params["bq"]
    k = x @ params["wk"] + params["bk"]
    v = x @ params["wv"] + params["bv"]
    scores = jnp.einsum("bqa,bka->bqk", q, k) / (q.shape[-1] ** 0.5)
    w = jax.nn.softmax(scores, axis=-1)
    att = jnp.einsum("bqk,bka->bqa", w, v)
    h = jnp.mean(att, axis=1)
    for (W, b) in params["shared"]:
        h = h @ W + b
        h = jnp.where(h > 0, h, LEAKY_SLOPE * h)
    price = h @ params["wp"] + params["bp"]
    volume = h @ params["wvol"] + params["bvol"]
    return jnp.concatenate([price, volume], axis=-1)


if __name__ == "__main__":
    # Small, module-consistent shapes.
    B, S = 2, 8
    state_dim, action_dim = 12, 4
    hidden_dim = 32
    num_layers = 3                       # -> 2 shared layers
    attention_dim = 32
    output_dims = {"price": 4, "volume": 4}

    key = jax.random.PRNGKey(0)
    k_state, k_action, k_params = jax.random.split(key, 3)

    state = jax.random.normal(k_state, (B, S, state_dim), jnp.float32)
    action = jax.random.normal(k_action, (B, action_dim), jnp.float32)
    params = init_params(k_params, state_dim, action_dim, hidden_dim,
                         num_layers, output_dims, attention_dim)

    out = multi_task_decoder_with_attention(state, action, params)
    out = jax.block_until_ready(out)

    ref = _reference(state, action, params)
    assert out.shape == (B, output_dims["price"] + output_dims["volume"])
    # Exact softmax now -> tight tolerance.
    assert jnp.allclose(out, ref, atol=1e-4, rtol=1e-4), "mismatch vs JAX reference"

    # Second check: multi-block grid + batch padding path (B not a multiple of TB).
    B2 = 20
    k_s2, k_a2 = jax.random.split(jax.random.PRNGKey(1), 2)
    state2 = jax.random.normal(k_s2, (B2, S, state_dim), jnp.float32)
    action2 = jax.random.normal(k_a2, (B2, action_dim), jnp.float32)
    out2 = jax.block_until_ready(
        multi_task_decoder_with_attention(state2, action2, params, block_b=8))
    ref2 = _reference(state2, action2, params)
    assert out2.shape == (B2, output_dims["price"] + output_dims["volume"])
    assert jnp.allclose(out2, ref2, atol=1e-4, rtol=1e-4), "mismatch (tiled path)"

    print("KERNEL_OK")
</pallas_src>

<mosaic_0001>
module attributes {stable_mosaic.version = 11 : i64} {
  func.func @kernel(%arg0: i32, %arg1: memref<2x8x12xf32, #tpu.memory_space<vmem>>, %arg2: memref<2x4xf32, #tpu.memory_space<vmem>>, %arg3: memref<12x384xf32, #tpu.memory_space<vmem>>, %arg4: memref<4x384xf32, #tpu.memory_space<vmem>>, %arg5: memref<1x384xf32, #tpu.memory_space<vmem>>, %arg6: memref<2x128x128xf32, #tpu.memory_space<vmem>>, %arg7: memref<2x1x128xf32, #tpu.memory_space<vmem>>, %arg8: memref<128x128xf32, #tpu.memory_space<vmem>>, %arg9: memref<1x128xf32, #tpu.memory_space<vmem>>, %arg10: memref<2x128xf32, #tpu.memory_space<vmem>>) attributes {dimension_semantics = [#tpu.dimension_semantics<parallel>], iteration_bounds = array<i64: 1>, scalar_prefetch = 0 : i64, scratch_operands = 0 : i64, tpu.core_type = #tpu.core_type<tc>, window_params = [{transform_indices = @transform_0, window_bounds = array<i64: 2, 8, 12>}, {transform_indices = @transform_1, window_bounds = array<i64: 2, 4>}, {pipeline_mode = #tpu.pipeline_mode<synchronous>, transform_indices = @transform_2, window_bounds = array<i64: 12, 384>}, {pipeline_mode = #tpu.pipeline_mode<synchronous>, transform_indices = @transform_3, window_bounds = array<i64: 4, 384>}, {pipeline_mode = #tpu.pipeline_mode<synchronous>, transform_indices = @transform_4, window_bounds = array<i64: 1, 384>}, {pipeline_mode = #tpu.pipeline_mode<synchronous>, transform_indices = @transform_5, window_bounds = array<i64: 2, 128, 128>}, {pipeline_mode = #tpu.pipeline_mode<synchronous>, transform_indices = @transform_6, window_bounds = array<i64: 2, 1, 128>}, {pipeline_mode = #tpu.pipeline_mode<synchronous>, transform_indices = @transform_7, window_bounds = array<i64: 128, 128>}, {pipeline_mode = #tpu.pipeline_mode<synchronous>, transform_indices = @transform_8, window_bounds = array<i64: 1, 128>}, {transform_indices = @transform_9, window_bounds = array<i64: 2, 128>}]} {
    %c0 = arith.constant 0 : index
    %c0_0 = arith.constant 0 : index
    %c0_1 = arith.constant 0 : index
    %0 = vector.load %arg1[%c0, %c0_0, %c0_1] : memref<2x8x12xf32, #tpu.memory_space<vmem>>, vector<2x8x12xf32>
    %c0_2 = arith.constant 0 : index
    %c0_3 = arith.constant 0 : index
    %1 = vector.load %arg2[%c0_2, %c0_3] : memref<2x4xf32, #tpu.memory_space<vmem>>, vector<2x4xf32>
    %2 = vector.shape_cast %0 : vector<2x8x12xf32> to vector<16x12xf32>
    %c0_4 = arith.constant 0 : index
    %c0_5 = arith.constant 0 : index
    %3 = vector.load %arg3[%c0_4, %c0_5] : memref<12x384xf32, #tpu.memory_space<vmem>>, vector<12x384xf32>
    %cst = arith.constant dense<0.000000e+00> : vector<16x384xf32>
    %4 = tpu.matmul %2, %3, %cst {dimension_numbers = #tpu.dot_dimension_numbers<[1], [0], [0], [1], [0, 0, 1, 1], [], []>} : vector<16x12xf32>, vector<12x384xf32>, vector<16x384xf32> -> vector<16x384xf32>
    %c0_6 = arith.constant 0 : index
    %c0_7 = arith.constant 0 : index
    %5 = vector.load %arg4[%c0_6, %c0_7] : memref<4x384xf32, #tpu.memory_space<vmem>>, vector<4x384xf32>
    %cst_8 = arith.constant dense<0.000000e+00> : vector<2x384xf32>
    %6 = tpu.matmul %1, %5, %cst_8 {dimension_numbers = #tpu.dot_dimension_numbers<[1], [0], [0], [1], [0, 0, 1, 1], [], []>} : vector<2x4xf32>, vector<4x384xf32>, vector<2x384xf32> -> vector<2x384xf32>
    %c0_9 = arith.constant 0 : index
    %c0_10 = arith.constant 0 : index
    %7 = vector.load %arg5[%c0_9, %c0_10] : memref<1x384xf32, #tpu.memory_space<vmem>>, vector<1x384xf32>
    %8 = vector.broadcast %7 : vector<1x384xf32> to vector<2x384xf32>
    %9 = arith.addf %6, %8 : vector<2x384xf32>
    %10 = vector.shape_cast %4 : vector<16x384xf32> to vector<2x8x384xf32>
    %11 = vector.shape_cast %9 : vector<2x384xf32> to vector<2x1x384xf32>
    %12 = vector.broadcast %11 : vector<2x1x384xf32> to vector<2x8x384xf32>
    %13 = arith.addf %10, %12 : vector<2x8x384xf32>
    %14 = vector.extract_strided_slice %13 {offsets = [0, 0, 0], sizes = [2, 8, 128], strides = [1, 1, 1]} : vector<2x8x384xf32> to vector<2x8x128xf32>
    %15 = vector.extract_strided_slice %13 {offsets = [0, 0, 128], sizes = [2, 8, 128], strides = [1, 1, 1]} : vector<2x8x384xf32> to vector<2x8x128xf32>
    %16 = vector.extract_strided_slice %13 {offsets = [0, 0, 256], sizes = [2, 8, 128], strides = [1, 1, 1]} : vector<2x8x384xf32> to vector<2x8x128xf32>
    "tpu.trace_start"() <{level = 10 : i32, message = "bqa,bka->bqk"}> : () -> ()
    %cst_11 = arith.constant dense<0.000000e+00> : vector<2x8x8xf32>
    %17 = tpu.matmul %14, %15, %cst_11 {dimension_numbers = #tpu.dot_dimension_numbers<[2], [2], [1], [1], [0, 0, 0, 1, 1, 1], [0], [0]>} : vector<2x8x128xf32>, vector<2x8x128xf32>, vector<2x8x8xf32> -> vector<2x8x8xf32>
    "tpu.trace_stop"() : () -> ()
    %cst_12 = arith.constant 0.176776692 : f32
    %18 = vector.broadcast %cst_12 : f32 to vector<2x8x8xf32>
    %19 = arith.mulf %17, %18 : vector<2x8x8xf32>
    %cst_13 = arith.constant dense<0xFF800000> : vector<2x8xf32>
    %20 = vector.multi_reduction <maximumf>, %19, %cst_13 [2] : vector<2x8x8xf32> to vector<2x8xf32>
    %21 = vector.shape_cast %20 : vector<2x8xf32> to vector<2x8x1xf32>
    %22 = vector.broadcast %21 : vector<2x8x1xf32> to vector<2x8x8xf32>
    %23 = arith.subf %19, %22 : vector<2x8x8xf32>
    %24 = math.exp %23 : vector<2x8x8xf32>
    %cst_14 = arith.constant dense<0.000000e+00> : vector<2x8xf32>
    %25 = vector.multi_reduction <add>, %24, %cst_14 [2] : vector<2x8x8xf32> to vector<2x8xf32>
    %26 = vector.shape_cast %25 : vector<2x8xf32> to vector<2x8x1xf32>
    %27 = vector.broadcast %26 : vector<2x8x1xf32> to vector<2x8x8xf32>
    %28 = arith.divf %24, %27 : vector<2x8x8xf32>
    %cst_15 = arith.constant dense<0.000000e+00> : vector<2x8xf32>
    %29 = vector.multi_reduction <add>, %28, %cst_15 [1] : vector<2x8x8xf32> to vector<2x8xf32>
    %cst_16 = arith.constant 8.000000e+00 : f32
    %30 = vector.broadcast %cst_16 : f32 to vector<2x8xf32>
    %31 = arith.divf %29, %30 : vector<2x8xf32>
    %32 = vector.shape_cast %31 : vector<2x8xf32> to vector<2x8x1xf32>
    %33 = vector.broadcast %32 : vector<2x8x1xf32> to vector<2x8x128xf32>
    %34 = arith.mulf %33, %16 : vector<2x8x128xf32>
    %cst_17 = arith.constant dense<0.000000e+00> : vector<2x128xf32>
    %35 = vector.multi_reduction <add>, %34, %cst_17 [1] : vector<2x8x128xf32> to vector<2x128xf32>
    %c0_18 = arith.constant 0 : index
    %c0_19 = arith.constant 0 : index
    %c0_20 = arith.constant 0 : index
    %36 = vector.load %arg6[%c0_18, %c0_19, %c0_20] : memref<2x128x128xf32, #tpu.memory_space<vmem>>, vector<1x128x128xf32>
    %37 = vector.shape_cast %36 : vector<1x128x128xf32> to vector<128x128xf32>
    %cst_21 = arith.constant dense<0.000000e+00> : vector<2x128xf32>
    %38 = tpu.matmul %35, %37, %cst_21 {dimension_numbers = #tpu.dot_dimension_numbers<[1], [0], [0], [1], [0, 0, 1, 1], [], []>} : vector<2x128xf32>, vector<128x128xf32>, vector<2x128xf32> -> vector<2x128xf32>
    %c0_22 = arith.constant 0 : index
    %c0_23 = arith.constant 0 : index
    %c0_24 = arith.constant 0 : index
    %39 = vector.load %arg7[%c0_22, %c0_23, %c0_24] : memref<2x1x128xf32, #tpu.memory_space<vmem>>, vector<1x1x128xf32>
    %40 = vector.shape_cast %39 : vector<1x1x128xf32> to vector<1x128xf32>
    %41 = vector.broadcast %40 : vector<1x128xf32> to vector<2x128xf32>
    %42 = arith.addf %38, %41 : vector<2x128xf32>
    %cst_25 = arith.constant 0.000000e+00 : f32
    %43 = vector.broadcast %cst_25 : f32 to vector<2x128xf32>
    %44 = arith.cmpf ogt, %42, %43 : vector<2x128xf32>
    %cst_26 = arith.constant 0.00999999977 : f32
    %45 = vector.broadcast %cst_26 : f32 to vector<2x128xf32>
    %46 = arith.mulf %45, %42 : vector<2x128xf32>
    %47 = arith.select %44, %42, %46 : vector<2x128xi1>, vector<2x128xf32>
    %c1 = arith.constant 1 : index
    %c0_27 = arith.constant 0 : index
    %c0_28 = arith.constant 0 : index
    %48 = vector.load %arg6[%c1, %c0_27, %c0_28] : memref<2x128x128xf32, #tpu.memory_space<vmem>>, vector<1x128x128xf32>
    %49 = vector.shape_cast %48 : vector<1x128x128xf32> to vector<128x128xf32>
    %cst_29 = arith.constant dense<0.000000e+00> : vector<2x128xf32>
    %50 = tpu.matmul %47, %49, %cst_29 {dimension_numbers = #tpu.dot_dimension_numbers<[1], [0], [0], [1], [0, 0, 1, 1], [], []>} : vector<2x128xf32>, vector<128x128xf32>, vector<2x128xf32> -> vector<2x128xf32>
    %c1_30 = arith.constant 1 : index
    %c0_31 = arith.constant 0 : index
    %c0_32 = arith.constant 0 : index
    %51 = vector.load %arg7[%c1_30, %c0_31, %c0_32] : memref<2x1x128xf32, #tpu.memory_space<vmem>>, vector<1x1x128xf32>
    %52 = vector.shape_cast %51 : vector<1x1x128xf32> to vector<1x128xf32>
    %53 = vector.broadcast %52 : vector<1x128xf32> to vector<2x128xf32>
    %54 = arith.addf %50, %53 : vector<2x128xf32>
    %cst_33 = arith.constant 0.000000e+00 : f32
    %55 = vector.broadcast %cst_33 : f32 to vector<2x128xf32>
    %56 = arith.cmpf ogt, %54, %55 : vector<2x128xf32>
    %cst_34 = arith.constant 0.00999999977 : f32
    %57 = vector.broadcast %cst_34 : f32 to vector<2x128xf32>
    %58 = arith.mulf %57, %54 : vector<2x128xf32>
    %59 = arith.select %56, %54, %58 : vector<2x128xi1>, vector<2x128xf32>
    %c0_35 = arith.constant 0 : index
    %c0_36 = arith.constant 0 : index
    %60 = vector.load %arg8[%c0_35, %c0_36] : memref<128x128xf32, #tpu.memory_space<vmem>>, vector<128x128xf32>
    %cst_37 = arith.constant dense<0.000000e+00> : vector<2x128xf32>
    %61 = tpu.matmul %59, %60, %cst_37 {dimension_numbers = #tpu.dot_dimension_numbers<[1], [0], [0], [1], [0, 0, 1, 1], [], []>} : vector<2x128xf32>, vector<128x128xf32>, vector<2x128xf32> -> vector<2x128xf32>
    %c0_38 = arith.constant 0 : index
    %c0_39 = arith.constant 0 : index
    %62 = vector.load %arg9[%c0_38, %c0_39] : memref<1x128xf32, #tpu.memory_space<vmem>>, vector<1x128xf32>
    %63 = vector.broadcast %62 : vector<1x128xf32> to vector<2x128xf32>
    %64 = arith.addf %61, %63 : vector<2x128xf32>
    %c0_40 = arith.constant 0 : index
    %c0_41 = arith.constant 0 : index
    %65 = vector.load %arg10[%c0_40, %c0_41] : memref<2x128xf32, #tpu.memory_space<vmem>>, vector<2x128xf32>
    tpu.vector_store %arg10[%c0_40, %c0_41], %64 {strides = array<i32>} : memref<2x128xf32, #tpu.memory_space<vmem>>, vector<2x128xf32>,
    return
  }
  func.func @transform_0(%arg0: i32) -> (i32, i32, i32) {
    %c0_i32 = arith.constant 0 : i32
    %c0_i32_0 = arith.constant 0 : i32
    %c0_i32_1 = arith.constant 0 : i32
    return %arg0, %c0_i32, %c0_i32_0 : i32, i32, i32
  }
  func.func @transform_1(%arg0: i32) -> (i32, i32) {
    %c0_i32 = arith.constant 0 : i32
    %c0_i32_0 = arith.constant 0 : i32
    return %arg0, %c0_i32 : i32, i32
  }
  func.func @transform_2(%arg0: i32) -> (i32, i32) {
    %c0_i32 = arith.constant 0 : i32
    %c0_i32_0 = arith.constant 0 : i32
    %c0_i32_1 = arith.constant 0 : i32
    return %c0_i32, %c0_i32_0 : i32, i32
  }
  func.func @transform_3(%arg0: i32) -> (i32, i32) {
    %c0_i32 = arith.constant 0 : i32
    %c0_i32_0 = arith.constant 0 : i32
    %c0_i32_1 = arith.constant 0 : i32
    return %c0_i32, %c0_i32_0 : i32, i32
  }
  func.func @transform_4(%arg0: i32) -> (i32, i32) {
    %c0_i32 = arith.constant 0 : i32
    %c0_i32_0 = arith.constant 0 : i32
    %c0_i32_1 = arith.constant 0 : i32
    return %c0_i32, %c0_i32_0 : i32, i32
  }
  func.func @transform_5(%arg0: i32) -> (i32, i32, i32) {
    %c0_i32 = arith.constant 0 : i32
    %c0_i32_0 = arith.constant 0 : i32
    %c0_i32_1 = arith.constant 0 : i32
    %c0_i32_2 = arith.constant 0 : i32
    return %c0_i32, %c0_i32_0, %c0_i32_1 : i32, i32, i32
  }
  func.func @transform_6(%arg0: i32) -> (i32, i32, i32) {
    %c0_i32 = arith.constant 0 : i32
    %c0_i32_0 = arith.constant 0 : i32
    %c0_i32_1 = arith.constant 0 : i32
    %c0_i32_2 = arith.constant 0 : i32
    return %c0_i32, %c0_i32_0, %c0_i32_1 : i32, i32, i32
  }
  func.func @transform_7(%arg0: i32) -> (i32, i32) {
    %c0_i32 = arith.constant 0 : i32
    %c0_i32_0 = arith.constant 0 : i32
    %c0_i32_1 = arith.constant 0 : i32
    return %c0_i32, %c0_i32_0 : i32, i32
  }
  func.func @transform_8(%arg0: i32) -> (i32, i32) {
    %c0_i32 = arith.constant 0 : i32
    %c0_i32_0 = arith.constant 0 : i32
    %c0_i32_1 = arith.constant 0 : i32
    return %c0_i32, %c0_i32_0 : i32, i32
  }
  func.func @transform_9(%arg0: i32) -> (i32, i32) {
    %c0_i32 = arith.constant 0 : i32
    %c0_i32_0 = arith.constant 0 : i32
    return %arg0, %c0_i32 : i32, i32
  }
}

</mosaic_0001>

<bundles_post_ra>
// kernel: tpu_custom_call.1
= control target key start
LH: loop header
LB: loop body
LE: loop exit
PB: predicated region body
PF: predicated region fallthrough
CT: control target
= control target key end

     0   :  { %14 = vsyncpa [#allocation3], 0  ;;  %s1715_s0 = inlined_call_operand.hbm [shape: f32[2,8,12], index: 0, kind: input, shape index: {}]   ;;  %s1716_s1 = inlined_call_operand.vmem [shape: f32[2,4], index: 1, kind: input, shape index: {}]   ;;  %s1717_s2 = inlined_call_operand.hbm [shape: f32[12,384], index: 2, kind: input, shape index: {}]   ;;  %s1718_s3 = inlined_call_operand.hbm [shape: f32[4,384], index: 3, kind: input, shape index: {}]   ;;  %s1719_s4 = inlined_call_operand.vmem [shape: f32[1,384], index: 4, kind: input, shape index: {}]   ;;  %s1720_s5 = inlined_call_operand.hbm [shape: f32[2,128,128], index: 5, kind: input, shape index: {}]   ;;  %s1721_s6 = inlined_call_operand.vmem [shape: f32[2,1,128], index: 6, kind: input, shape index: {}]   ;;  %s1722_s7 = inlined_call_operand.hbm [shape: f32[128,128], index: 7, kind: input, shape index: {}]   ;;  %s1723_s8 = inlined_call_operand.vmem [shape: f32[1,128], index: 8, kind: input, shape index: {}]   ;;  %s1724_s9 = inlined_call_operand.hbm [shape: f32[2,128], index: 9, kind: output, shape index: {}]  }
   0x1   :  { %15 = vsyncpa [#allocation6], 0 }
   0x2   :  { %16 = vsyncpa [#allocation9], 0 }
   0x3   :  { %17 = vsyncpa [#allocation4], 0  ;;  %s1484_s30 = smov [#allocation5]   ;;  %s1344_s13 = scalar_lea.hbm %s1717_s2, 768 }
   0x4   :  { %s37_s10 = sshll.u32 %s1484_s30, 4  ;;  %p1345_p0 = scmp.ne.s32.totalorder %s1717_s2, %s1344_s13  ;;  %s38_s10 = int_to_ptr.vmem [resolvable:$true] %s37_s10 }
   0x5   :  { %p1348_p1 = scmp.lt.u32.totalorder %s1344_s13, %s1717_s2 }
   0x7   :  { %p1350_p2 = pnand %p1348_p1, %p1345_p0 }
   0x9   :  { %1353 = shalt.err (!%p1350_p2)
}
   0xa   :  { %s1354_s18 = scalar_lea.vmem %s38_s10, 768  ;;  %p1359_p4 = scmp.lt.s32.totalorder %s38_s10, %s38_s10 }
   0xb   :  { %p1355_p3 = scmp.ne.s32.totalorder %s38_s10, %s1354_s18  ;;  %p1360_p5 = scmp.lt.s32.totalorder %s1354_s18, %s1354_s18 }
   0xd   :  { %p1361_p6 = por %p1360_p5, %p1359_p4 }
   0xf   :  { %p1362_p7 = pnand %p1361_p6, %p1355_p3 }
  0x11   :  { %1365 = shalt.err (!%p1362_p7)
}
  0x12   :  { %s1485_s19 = smov 384   ;;  %s1486_s20 = smov 24  }
  0x13   :  { %43 = dma.hbm_to_vmem [thread:$0]  %s1717_s2, 768, %s38_s10, [#allocation6], %s1485_s19, %s1485_s19, %s1486_s20  }
  0x14   :  { %s1487_s23 = smov [#allocation8]   ;;  %s1488_s25 = smov [#allocation2]  }
  0x15   :  { %s61_s24 = sshll.u32 %s1487_s23, 4  ;;  %s23_s26 = sshll.u32 %s1488_s25, 4  ;;  %s62_s24 = int_to_ptr.vmem [resolvable:$true] %s61_s24  ;;  %s24_s26 = int_to_ptr.vmem [resolvable:$true] %s23_s26 }
  0x16   :  { %s1366_s29 = scalar_lea.hbm %s1720_s5, 4096 }
  0x17   :  { %p1367_p8 = scmp.ne.s32.totalorder %s1720_s5, %s1366_s29  ;;  %p1370_p9 = scmp.lt.u32.totalorder %s1366_s29, %s1720_s5 }
  0x19   :  { %p1372_p10 = pnand %p1370_p9, %p1367_p8 }
  0x1b   :  { %1375 = shalt.err (!%p1372_p10)
}
  0x1c   :  { %s1376_s2 = scalar_lea.vmem %s62_s24, 4096  ;;  %p1381_p12 = scmp.lt.s32.totalorder %s62_s24, %s62_s24 }
  0x1d   :  { %p1377_p11 = scmp.ne.s32.totalorder %s62_s24, %s1376_s2  ;;  %p1382_p13 = scmp.lt.s32.totalorder %s1376_s2, %s1376_s2 }
  0x1f   :  { %p1383_p0 = por %p1382_p13, %p1381_p12 }
  0x21   :  { %p1384_p1 = pnand %p1383_p0, %p1377_p11 }
  0x23   :  { %1387 = shalt.err (!%p1384_p1)
}
  0x24   :  { %s1489_s10 = smov 128   ;;  %s1490_s14 = smov 8  }
  0x25   :  { %67 = dma.hbm_to_vmem [thread:$0]  %s1720_s5, 4096, %s62_s24, [#allocation9], %s1489_s10, %s1489_s10, %s1490_s14  }
  0x26   :  { %s1388_s19 = scalar_lea.hbm %s1715_s0, 256 }
  0x27   :  { %p1389_p2 = scmp.ne.s32.totalorder %s1715_s0, %s1388_s19  ;;  %p1392_p3 = scmp.lt.u32.totalorder %s1388_s19, %s1715_s0 }
  0x29   :  { %p1394_p4 = pnand %p1392_p3, %p1389_p2 }
  0x2b   :  { %1397 = shalt.err (!%p1394_p4)
}
  0x2c   :  { %s1398_s25 = scalar_lea.vmem %s24_s26, 256  ;;  %p1403_p6 = scmp.lt.s32.totalorder %s24_s26, %s24_s26 }
  0x2d   :  { %p1399_p5 = scmp.ne.s32.totalorder %s24_s26, %s1398_s25  ;;  %p1404_p7 = scmp.lt.s32.totalorder %s1398_s25, %s1398_s25 }
  0x2f   :  { %p1405_p8 = por %p1404_p7, %p1403_p6 }
  0x31   :  { %p1406_p9 = pnand %p1405_p8, %p1399_p5 }
  0x33   :  { %1409 = shalt.err (!%p1406_p9)
}
  0x34   :  { %29 = dma.hbm_to_vmem [thread:$0]  %s1715_s0, 256, %s24_s26, [#allocation3], %s1489_s10, %s1489_s10, %s1490_s14  }
  0x35   :  { %s1491_s27 = smov [#allocation7]   ;;  %s1492_s29 = smov [#allocation10]  }
  0x36   :  { %s50_s28 = sshll.u32 %s1491_s27, 4  ;;  %s75_s30 = sshll.u32 %s1492_s29, 4  ;;  %s51_s28 = int_to_ptr.vmem [resolvable:$true] %s50_s28  ;;  %s76_s30 = int_to_ptr.vmem [resolvable:$true] %s75_s30 }
  0x37   :  { %s1410_s13 = scalar_lea.hbm %s1718_s3, 192 }
  0x38   :  { %p1411_p10 = scmp.ne.s32.totalorder %s1718_s3, %s1410_s13  ;;  %p1414_p11 = scmp.lt.u32.totalorder %s1410_s13, %s1718_s3 }
  0x3a   :  { %p1416_p12 = pnand %p1414_p11, %p1411_p10 }
  0x3c   :  { %1419 = shalt.err (!%p1416_p12)
}
  0x3d   :  { %s1420_s0 = scalar_lea.vmem %s51_s28, 192  ;;  %p1425_p0 = scmp.lt.s32.totalorder %s51_s28, %s51_s28 }
  0x3e   :  { %p1421_p13 = scmp.ne.s32.totalorder %s51_s28, %s1420_s0  ;;  %p1426_p1 = scmp.lt.s32.totalorder %s1420_s0, %s1420_s0 }
  0x40   :  { %p1427_p2 = por %p1426_p1, %p1425_p0 }
  0x42   :  { %p1428_p3 = pnand %p1427_p2, %p1421_p13 }
  0x44   :  { %1431 = shalt.err (!%p1428_p3)
}
  0x45   :  { %53 = dma.hbm_to_vmem [thread:$0]  %s1718_s3, 192, %s51_s28, [#allocation6]  }
  0x46   :  { %s1432_s21 = scalar_lea.hbm %s1722_s7, 2048 }
  0x47   :  { %p1433_p4 = scmp.ne.s32.totalorder %s1722_s7, %s1432_s21  ;;  %p1436_p5 = scmp.lt.u32.totalorder %s1432_s21, %s1722_s7 }
  0x49   :  { %p1438_p6 = pnand %p1436_p5, %p1433_p4 }
  0x4b   :  { %1441 = shalt.err (!%p1438_p6)
}
  0x4c   :  { %s1442_s24 = scalar_lea.vmem %s76_s30, 2048  ;;  %p1447_p8 = scmp.lt.s32.totalorder %s76_s30, %s76_s30 }
  0x4d   :  { %p1443_p7 = scmp.ne.s32.totalorder %s76_s30, %s1442_s24  ;;  %p1448_p9 = scmp.lt.s32.totalorder %s1442_s24, %s1442_s24 }
  0x4f   :  { %p1449_p10 = por %p1448_p9, %p1447_p8 }
  0x51   :  { %p1450_p11 = pnand %p1449_p10, %p1443_p7 }
  0x53   :  { %1453 = shalt.err (!%p1450_p11)
}
  0x54   :  { %81 = dma.hbm_to_vmem [thread:$0]  %s1722_s7, 2048, %s76_s30, [#allocation9], %s1489_s10, %s1489_s10, %s1490_s14  }
  0x55   :  { %1476 = dma.done.wait [#allocation3], 256  }
  0x56   :  { %1477 = vsyncadd [#allocation3], 4294967040 }
  0x57   :  { %1478 = dma.done.wait [#allocation6], 960  }
  0x58   :  { %1479 = vsyncadd [#allocation6], 4294966336 }
  0x59   :  { %1480 = dma.done.wait [#allocation9], 6144  }
  0x5a   :  { %1481 = vsyncadd [#allocation9], 4294961152  ;;  %v1493_v0 = vmov 0.0   ;;  %vm1494_vm0 = vmmov 0   ;;  %vm115_vm1 = vcmask 1043456   ;;  %vm1495_vm2 = vmmov 1  }
  0x5b   :  { %189 = vmatprep.mubr.f32.mxu0 %v1493_v0  ;;  %1163 = vmatprep.mubr.msk.f32.mxu1 %vm1494_vm0, %v1493_v0  ;;  %vm1622_vm3 = vmpackc.low %vm115_vm1, %vm1495_vm2  ;;  %v103_v2 = vld [vmem:[#allocation5 + $0x8] sm:$0xff]  ;;  %v106_v3 = vld [vmem:[#allocation5 + $0x20] sm:$0xf]  ;;  %vm108_vm4 = vcmask 97280   ;;  %vm299_vm5 = vcmask 31744   ;;  %v281_v17 = vlaneseq  ;;  %vm662_vm6 = vcmask 64512  }
  0x5c   :  { %v102_v4 = vld [vmem:[#allocation5] sm:$0xff]  ;;  %v1236_v5 = vpack.c.bf16 %v106_v3, %v103_v2  ;;  %v105_v6 = vld [vmem:[#allocation5 + $0x18] sm:$0xf]  ;;  %v104_v7 = vld [vmem:[#allocation5 + $0x10] sm:$0xff]  ;;  %v1496_v26 = vmov 1966171168  }
  0x5d   :  { %v1239_v8 = vpack.c.bf16 %v105_v6, %v102_v4  ;;  %v107_v9 = vld [vmem:[#allocation5 + $0x28] sm:$0xf]  ;;  %v277_v10 = vld [vmem:[#allocation7] sm:$0xff]  ;;  %v100_v14 = vld [vmem:[#allocation2 + $0x8] sm:$0xff]  ;;  %v282_v20 = vshrl.u32 %v281_v17, 7  ;;  %v455_v27 = vunpack.c.l.s4 %v1496_v26  ;;  %vm747_vm7 = vcmask 1041409  }
  0x5e   :  { %1238 = vmatprep.subr.msk.bf16.mxu0 %vm1622_vm3, %v1236_v5  ;;  %v1242_v11 = vpack.c.bf16 %v107_v9, %v104_v7  ;;  %v99_v12 = vld [vmem:[#allocation2] sm:$0xff]  ;;  %v298_v13 = vcombine.high %v277_v10, %v277_v10  ;;  %v278_v16 = vld [vmem:[#allocation7 + $0x8] sm:$0xf]  ;;  %v722_v17 = vld [vmem:[#allocation8] sm:$0xff]  ;;  %s1498_s13 = smov [#allocation11]  }
  0x5f   :  { %1241 = vmatpush1.bf16.msk.msra.mxu0 %vm1622_vm3, %v1239_v8  ;;  %v101_v15 = vld [vmem:[%s1716_s1] sm:$0x3]  ;;  %v283_v23 = vsub.s32 0, %v282_v20  ;;  %v287_v25 = vsub.s32 1, %v282_v20  ;;  %v291_v31 = vsub.s32 2, %v282_v20  ;;  %v456_v33 = vunpack.c.0.s8 %v455_v27  ;;  %s1021_s2 = sshll.u32 %s1498_s13, 4  ;;  %s1022_s2 = int_to_ptr.vmem [resolvable:$true] %s1021_s2 }
  0x60   :  { %1244 = vmatprep.subr.msk.bf16.mxu0 %vm1622_vm3, %v1242_v11  ;;  %v279_v24 = vld [vmem:[%s1719_s4] sm:$0x7]  ;;  %s1454_s15 = scalar_lea.vmem %s1022_s2, 32  ;;  %p1459_p13 = scmp.lt.s32.totalorder %s1022_s2, %s1022_s2 }
  0x61   :  { %v284_v30 = vrot.slane %v279_v24, %v283_v23  ;;  %v288_v32 = vrot.slane %v279_v24, %v287_v25  ;;  %v292_v37 = vrot.slane %v279_v24, %v291_v31  ;;  %v459_v39 = vsub.s32 %v456_v33, %v282_v20  ;;  %v726_v24 = vld [vmem:[#allocation8 + $0x20] sm:$0xff]  ;;  %v729_v33 = vld [vmem:[#allocation8 + $0x38] sm:$0xff]  ;;  %p1455_p12 = scmp.ne.s32.totalorder %s1022_s2, %s1454_s15  ;;  %p1460_p0 = scmp.lt.s32.totalorder %s1454_s15, %s1454_s15 }
  0x62   :  { %1034 = vmatmul.mubr.msk.f32.vlgmr.msra.gmra.mrb[0].mxu0 %vm108_vm4, %v99_v12  ;;  %v1497_v20 = vmov 0.0|0.0  }
  0x63   :  { %1247 = vmatpush3.bf16.msk.msra.mxu0 %vm1622_vm3, %v1242_v11  ;;  %195 = vmatprep.mubr.f32.mxu0 %v1493_v0  ;;  %p1461_p1 = por %p1460_p0, %p1459_p13 }
  0x64   :  { %1039 = vmatprep.subr.msk.mxu0 %vm115_vm1, %v298_v13  ;;  %1248 = vmatprep.subr.bf16.mxu1 %v1497_v20 }
  0x65   :  { %p1462_p2 = pnand %p1461_p1, %p1455_p12 }
  0x66   :  { %1035 = vmatmul.mubr.msk.f32.gmra.mrb[2].mxu0 %vm108_vm4, %v100_v14 }
  0x67   :  { %1113 = vmatprep.mubr.msk.f32.mxu0 %vm108_vm4, %v99_v12 }
  0x6a   :  { %1114 = vmatmul.mubr.msk.f32.vlgmr.msra.gmra.mrb[4].mxu0 %vm108_vm4, %v100_v14 }
  0x6b   :  { %1040 = vmatpush1.msk.msra.mxu0 %vm115_vm1, %v277_v10  ;;  %373 = vmatprep.mubr.f32.mxu0 %v1493_v0 }
  0x6c   :  { %1116 = vmatprep.subr.mxu0 %v1493_v0 }
  0x6e   :  { %1041 = vmatmul.mubr.msk.f32.vlgmr.msra.gmra.mrb[6].mxu0 %vm299_vm5, %v101_v15 }
  0x6f   :  { %1117 = vmatpush3.msk.msra.mxu0 %vm115_vm1, %v278_v16  ;;  %1118 = vmatprep.mubr.msk.f32.mxu0 %vm1494_vm0, %v1493_v0 }
  0x70   :  { %1121 = vmatprep.subr.mxu0 %v1493_v0 }
  0x72   :  { %1119 = vmatmul.mubr.msk.f32.vlgmr.msra.gmra.mrb[8].mxu0 %vm299_vm5, %v101_v15 }
  0x73   :  { %1123 = vmatprep.mubr.msk.f32.mxu0 %vm1494_vm0, %v1493_v0 }
 0x135   :  { %v191_v18 = vpop.f32.mrb[0].mxu0 }
 0x136   :  { %v193_v19 = vpop.f32.mrb[1].mxu0 }
 0x139   :  { %v197_v21 = vpop.f32.mrb[2].mxu0 }
 0x13a   :  { %v199_v22 = vpop.f32.mrb[3].mxu0 }
 0x13d   :  { %v1115_v28 = vpop.f32.mrb[4].mxu0 }
 0x13e   :  { %v268_v29 = vpop.f32.mrb[5].mxu0 }
 0x141   :  { %v375_v34 = vpop.f32.mrb[6].mxu0 }
 0x142   :  { %v376_v35 = vadd.f32 %v375_v34, %v284_v30  ;;  %v377_v36 = vpop.f32.mrb[7].mxu0 }
 0x143   :  { %v378_v38 = vadd.f32 %v377_v36, %v288_v32  ;;  %v728_v32 = vld [vmem:[#allocation8 + $0x30] sm:$0xff] }
 0x144   :  { %v1258_v36 = vpack.c.bf16 %v729_v33, %v728_v32 }
 0x145   :  { %v453_v40 = vcombine.low %v376_v35, %v378_v38  ;;  %v446_v41 = vpop.f32.mrb[8].mxu0 }
 0x146   :  { %v447_v42 = vadd.f32 %v446_v41, %v292_v37  ;;  %v1120_v43 = vpop.f32.mrb[9].mxu0  ;;  %v731_v41 = vld [vmem:[#allocation8 + $0x48] sm:$0xff] }
 0x147   :  { %v460_v44 = vrot.slane %v453_v40, %v459_v39  ;;  %v730_v40 = vld [vmem:[#allocation8 + $0x40] sm:$0xff] }
 0x148   :  { %v467_v45 = vrot.slane %v447_v42, %v459_v39 }
 0x14a   :  { %v468_v46 = vcombine.low %v460_v44, %v467_v45  ;;  %v469_v47 = vcombine.high %v460_v44, %v467_v45  ;;  %v1261_v44 = vpack.c.bf16 %v731_v41, %v730_v40 }
 0x14c   :  { %v476_v48 = vrot.slane %v468_v46, %v459_v39  ;;  %v483_v49 = vrot.slane %v469_v47, %v459_v39  ;;  %v732_v47 = vld [vmem:[#allocation8 + $0x50] sm:$0xff] }
 0x14e   :  { %v491_v50 = vrot.slane %v476_v48, %v287_v25  ;;  %v487_v51 = vrot.slane %v476_v48, %v283_v23  ;;  %v503_v52 = vrot.slane %v483_v49, %v287_v25  ;;  %v499_v53 = vrot.slane %v483_v49, %v283_v23  ;;  %v727_v25 = vld [vmem:[#allocation8 + $0x28] sm:$0xff] }
 0x14f   :  { %v495_v54 = vrot.slane %v476_v48, %v291_v31  ;;  %v507_v55 = vrot.slane %v483_v49, %v291_v31  ;;  %v1255_v26 = vpack.c.bf16 %v727_v25, %v726_v24  ;;  %v733_v48 = vld [vmem:[#allocation8 + $0x58] sm:$0xff] }
 0x150   :  { %v515_v56 = vadd.f32 %v491_v50, %v193_v19  ;;  %v514_v57 = vadd.f32 %v487_v51, %v191_v18  ;;  %v518_v58 = vadd.f32 %v503_v52, %v199_v22  ;;  %v517_v59 = vadd.f32 %v499_v53, %v197_v21  ;;  %v723_v18 = vld [vmem:[#allocation8 + $0x8] sm:$0xff]  ;;  %v724_v19 = vld [vmem:[#allocation8 + $0x10] sm:$0xff]  ;;  %v725_v22 = vld [vmem:[#allocation8 + $0x18] sm:$0xff] }
 0x151   :  { %v1651_v60 = vadd.f32 %v495_v54, %v268_v29  ;;  %v1653_v61 = vadd.f32 %v1115_v28, %v507_v55  ;;  %v1249_v21 = vpack.c.bf16 %v723_v18, %v722_v17  ;;  %v1252_v23 = vpack.c.bf16 %v725_v22, %v724_v19  ;;  %v734_v54 = vld [vmem:[#allocation8 + $0x60] sm:$0xff]  ;;  %v735_v55 = vld [vmem:[#allocation8 + $0x68] sm:$0xff]  ;;  %v834_v18 = vld [vmem:[#allocation8 + $0xd0] sm:$0xff] }
 0x152   :  { %1122 = vmatpush3.xpose.msra.mxu0 %v515_v56  ;;  %v1264_v51 = vpack.c.bf16 %v733_v48, %v732_v47  ;;  %v835_v19 = vld [vmem:[#allocation8 + $0xd8] sm:$0xff]  ;;  %v836_v22 = vld [vmem:[#allocation8 + $0xe0] sm:$0xff] }
 0x153   :  { %1126 = vmatprep.subr.mxu0 %v1493_v0  ;;  %1250 = vmatpush3.bf16.msra.mxu1 %v1249_v21  ;;  %v1288_v21 = vpack.c.bf16 %v835_v19, %v834_v18  ;;  %v924_v47 = vld [vmem:[#allocation10 + $0x18] sm:$0xff] }
 0x154   :  { %1251 = vmatprep.subr.bf16.mxu1 %v1497_v20 }
 0x155   :  { %1124 = vmatmul.mubr.f32.vlgmr.msra.gmra.mrb[10].mxu0 %v514_v57 }
 0x156   :  { %1127 = vmatpush3.xpose.msra.mxu0 %v518_v58  ;;  %1128 = vmatprep.mubr.msk.f32.mxu0 %vm1494_vm0, %v1493_v0  ;;  %v1267_v58 = vpack.c.bf16 %v735_v55, %v734_v54  ;;  %v929_v54 = vld [vmem:[#allocation10 + $0x40] sm:$0xff]  ;;  %v930_v55 = vld [vmem:[#allocation10 + $0x48] sm:$0xff] }
 0x157   :  { %1272 = vmatprep.subr.bf16.mxu0 %v1497_v20  ;;  %1253 = vmatpush3.bf16.msra.mxu1 %v1252_v23  ;;  %v837_v23 = vld [vmem:[#allocation8 + $0xe8] sm:$0xff] }
 0x158   :  { %1254 = vmatprep.subr.bf16.mxu1 %v1497_v20  ;;  %v1291_v24 = vpack.c.bf16 %v837_v23, %v836_v22 }
 0x159   :  { %1129 = vmatmul.mubr.f32.vlgmr.msra.gmra.mrb[12].mxu0 %v517_v59 }
 0x15a   :  { %1198 = vmatprep.mubr.msk.f32.mxu0 %vm1494_vm0, %v1493_v0 }
 0x15b   :  { %1256 = vmatpush3.bf16.msra.mxu1 %v1255_v26 }
 0x15c   :  { %1257 = vmatprep.subr.bf16.mxu1 %v1497_v20 }
 0x15f   :  { %1259 = vmatpush3.bf16.msra.mxu1 %v1258_v36 }
 0x160   :  { %1260 = vmatprep.subr.bf16.mxu1 %v1497_v20 }
 0x163   :  { %1262 = vmatpush3.bf16.msra.mxu1 %v1261_v44  ;;  %v922_v44 = vld [vmem:[#allocation10 + $0x8] sm:$0xff] }
 0x164   :  { %1263 = vmatprep.subr.bf16.mxu1 %v1497_v20 }
 0x167   :  { %1265 = vmatpush3.bf16.msra.mxu1 %v1264_v51 }
 0x168   :  { %1266 = vmatprep.subr.bf16.mxu1 %v1497_v20 }
 0x16b   :  { %1268 = vmatpush3.bf16.msra.mxu1 %v1267_v58  ;;  %v932_v58 = vld [vmem:[#allocation10 + $0x58] sm:$0xff] }
 0x16c   :  { %1269 = vmatprep.subr.bf16.mxu1 %v1497_v20 }
 0x228   :  { %v586_v62 = vpop.f32.mrb[10].mxu0 }
 0x229   :  { %v660_v63 = vmul.f32 0.17677669, %v586_v62  ;;  %v1125_v1 = vpop.f32.mrb[11].mxu0  ;;  %v736_v62 = vld [vmem:[#allocation8 + $0x70] sm:$0xff] }
 0x22b   :  { %v663_v2 = vsel %vm662_vm6, %v660_v63, -inf }
 0x22c   :  { %664 = vmax.xlane.f32.xlu0 %v663_v2  ;;  %v656_v3 = vpop.f32.mrb[12].mxu0 }
 0x22d   :  { %v661_v4 = vmul.f32 0.17677669, %v656_v3  ;;  %v1130_v5 = vpop.f32.mrb[13].mxu0  ;;  %v824_v3 = vld [vmem:[#allocation8 + $0x80] sm:$0xff] }
 0x22e   :  { %v826_v5 = vld [vmem:[#allocation8 + $0x90] sm:$0xff] }
 0x22f   :  { %v666_v6 = vsel %vm662_vm6, %v661_v4, -inf }
 0x230   :  { %667 = vmax.xlane.f32.xlu0 %v666_v6 }
 0x2b9   :  { %v665_v7 = vpop.xlane.xlu0 %664 }
 0x2ba   :  { %v669_v8 = vsub.f32 %v660_v63, %v665_v7  ;;  %v737_v63 = vld [vmem:[#allocation8 + $0x78] sm:$0xff] }
 0x2bb   :  { %v1270_v2 = vpack.c.bf16 %v737_v63, %v736_v62  ;;  %v827_v7 = vld [vmem:[#allocation8 + $0x98] sm:$0xff]  ;;  %v933_v62 = vld [vmem:[#allocation10 + $0x60] sm:$0xff]  ;;  %v934_v63 = vld [vmem:[#allocation10 + $0x68] sm:$0xff] }
 0x2bc   :  { %v671_v9 = vmul.f32 1.442695, %v669_v8  ;;  %v1276_v8 = vpack.c.bf16 %v827_v7, %v826_v5 }
 0x2bd   :  { %v668_v10 = vpop.xlane.xlu0 %667  ;;  %1271 = vmatpush3.bf16.msra.mxu1 %v1270_v2  ;;  %v1044_v2 = vld [vmem:[%s1721_s6] ss:$0 sm:$0xff] }
 0x2be   :  { %1336 = vpow2.f32 %v671_v9  ;;  %v670_v11 = vsub.f32 %v661_v4, %v668_v10  ;;  %1296 = vmatprep.subr.bf16.mxu1 %v1497_v20  ;;  %v825_v4 = vld [vmem:[#allocation8 + $0x88] sm:$0xff]  ;;  %v828_v9 = vld [vmem:[#allocation8 + $0xa0] sm:$0xff] }
 0x2bf   :  { %v1273_v6 = vpack.c.bf16 %v825_v4, %v824_v3  ;;  %v829_v10 = vld [vmem:[#allocation8 + $0xa8] sm:$0xff] }
 0x2c0   :  { %v673_v12 = vmul.f32 1.442695, %v670_v11  ;;  %v1279_v11 = vpack.c.bf16 %v829_v10, %v828_v9  ;;  %v936_v9 = vld [vmem:[#allocation10 + $0x78] sm:$0xff] }
 0x2c1   :  { %1274 = vmatpush3.bf16.msra.mxu0 %v1273_v6 }
 0x2c2   :  { %1338 = vpow2.f32 %v673_v12  ;;  %1275 = vmatprep.subr.bf16.mxu0 %v1497_v20  ;;  %v830_v12 = vld [vmem:[#allocation8 + $0xb0] sm:$0xff] }
 0x2c5   :  { %1277 = vmatpush3.bf16.msra.mxu0 %v1276_v8  ;;  %v935_v8 = vld [vmem:[#allocation10 + $0x70] sm:$0xff] }
 0x2c6   :  { %1278 = vmatprep.subr.bf16.mxu0 %v1497_v20  ;;  %v1318_v10 = vpack.c.bf16 %v936_v9, %v935_v8 }
 0x2c8   :  { %v1337_v13 = vpop.eup %1336 }
 0x2c9   :  { %v675_v14 = vsel %vm662_vm6, %v1337_v13, 0.0  ;;  %1280 = vmatpush3.bf16.msra.mxu0 %v1279_v11  ;;  %v1046_v11 = vld [vmem:[%s1721_s6 + $0x1] ss:$0 sm:$0xff] }
 0x2ca   :  { %676 = vadd.xlane.f32.xlu1 %v675_v14  ;;  %1281 = vmatprep.subr.bf16.mxu0 %v1497_v20 }
 0x2cc   :  { %v1339_v15 = vpop.eup %1338 }
 0x2cd   :  { %v678_v16 = vsel %vm662_vm6, %v1339_v15, 0.0 }
 0x2ce   :  { %679 = vadd.xlane.f32.xlu1 %v678_v16  ;;  %v833_v16 = vld [vmem:[#allocation8 + $0xc8] sm:$0xff] }
 0x357   :  { %v677_v27 = vpop.xlane.xlu1 %676 }
 0x358   :  { %1340 = vrcp.f32 %v677_v27 }
 0x35b   :  { %v680_v28 = vpop.xlane.xlu1 %679 }
 0x35c   :  { %1342 = vrcp.f32 %v680_v28 }
 0x362   :  { %v1341_v29 = vpop.eup %1340 }
 0x363   :  { %v682_v30 = vmul.f32 %v1341_v29, %v1337_v13  ;;  %v831_v13 = vld [vmem:[#allocation8 + $0xb8] sm:$0xff] }
 0x364   :  { %v1282_v14 = vpack.c.bf16 %v831_v13, %v830_v12 }
 0x365   :  { %v685_v31 = vsel %vm662_vm6, %v682_v30, 0.0 }
 0x366   :  { %v1343_v34 = vpop.eup %1342  ;;  %v686_v35 = vrot.slane %v685_v31, 4  ;;  %1283 = vmatpush3.bf16.msra.mxu0 %v1282_v14 }
 0x367   :  { %v684_v37 = vmul.f32 %v1343_v34, %v1339_v15  ;;  %v832_v15 = vld [vmem:[#allocation8 + $0xc0] sm:$0xff]  ;;  %1284 = vmatprep.subr.bf16.mxu0 %v1497_v20 }
 0x368   :  { %v687_v38 = vadd.f32 %v686_v35, %v685_v31  ;;  %v1285_v17 = vpack.c.bf16 %v833_v16, %v832_v15  ;;  %v1047_v16 = vld [vmem:[%s1723_s8] ss:$0 sm:$0xff] }
 0x369   :  { %v692_v39 = vsel %vm662_vm6, %v684_v37, 0.0 }
 0x36a   :  { %v688_v42 = vrot.slane %v687_v38, 2  ;;  %v693_v43 = vrot.slane %v692_v39, 4  ;;  %1286 = vmatpush3.bf16.msra.mxu0 %v1285_v17 }
 0x36b   :  { %1287 = vmatprep.subr.bf16.mxu0 %v1497_v20 }
 0x36c   :  { %v689_v45 = vadd.f32 %v688_v42, %v687_v38  ;;  %v694_v46 = vadd.f32 %v693_v43, %v692_v39  ;;  %v839_v42 = vld [vmem:[#allocation8 + $0xf8] sm:$0xff] }
 0x36e   :  { %v690_v49 = vrot.slane %v689_v45, 1  ;;  %v695_v50 = vrot.slane %v694_v46, 2  ;;  %1289 = vmatpush3.bf16.msra.mxu0 %v1288_v21 }
 0x36f   :  { %1290 = vmatprep.subr.bf16.mxu0 %v1497_v20 }
 0x370   :  { %v691_v52 = vadd.f32 %v690_v49, %v689_v45  ;;  %v696_v53 = vadd.f32 %v695_v50, %v694_v46  ;;  %v923_v45 = vld [vmem:[#allocation10 + $0x10] sm:$0xff]  ;;  %v925_v49 = vld [vmem:[#allocation10 + $0x20] sm:$0xff]  ;;  %v926_v50 = vld [vmem:[#allocation10 + $0x28] sm:$0xff] }
 0x371   :  { %v1300_v48 = vpack.c.bf16 %v924_v47, %v923_v45  ;;  %v1303_v51 = vpack.c.bf16 %v926_v50, %v925_v49 }
 0x372   :  { %v700_v56 = vmul.f32 0.125, %v691_v52  ;;  %v697_v57 = vrot.slane %v696_v53, 1  ;;  %1292 = vmatpush3.bf16.msra.mxu0 %v1291_v24  ;;  %v928_v52 = vld [vmem:[#allocation10 + $0x38] sm:$0xff] }
 0x373   :  { %1293 = vmatprep.subr.bf16.mxu0 %v1497_v20 }
 0x374   :  { %703 = vbcast.lane.b32.xlu0 %v700_v56, 256  ;;  %v698_v59 = vadd.f32 %v697_v57, %v696_v53  ;;  %v1309_v56 = vpack.c.bf16 %v930_v55, %v929_v54  ;;  %v931_v57 = vld [vmem:[#allocation10 + $0x50] sm:$0xff] }
 0x376   :  { %v701_v1 = vmul.f32 0.125, %v698_v59  ;;  %v1312_v59 = vpack.c.bf16 %v932_v58, %v931_v57 }
 0x378   :  { %706 = vbcast.lane.b32.xlu1 %v701_v1, 256  ;;  %v1315_v1 = vpack.c.bf16 %v934_v63, %v933_v62 }
 0x3e6   :  { %v704_v25 = vpop.permute.xlu0 %703 }
 0x3e7   :  { %v708_v26 = vmul.f32 %v704_v25, %v1651_v60  ;;  %v838_v60 = vld [vmem:[#allocation8 + $0xf0] sm:$0xff] }
 0x3e8   :  { %v1294_v43 = vpack.c.bf16 %v839_v42, %v838_v60 }
 0x3e9   :  { %v710_v27 = vrot.slane %v708_v26, 4 }
 0x3ea   :  { %v707_v28 = vpop.permute.xlu1 %706  ;;  %1295 = vmatpush3.bf16.msra.mxu0 %v1294_v43 }
 0x3eb   :  { %v711_v29 = vadd.f32 %v710_v27, %v708_v26  ;;  %v709_v30 = vmul.f32 %v707_v28, %v1653_v61  ;;  %v921_v61 = vld [vmem:[#allocation10] sm:$0xff] }
 0x3ec   :  { %v1297_v46 = vpack.c.bf16 %v922_v44, %v921_v61 }
 0x3ed   :  { %v712_v31 = vrot.slane %v711_v29, 2  ;;  %v716_v32 = vrot.slane %v709_v30, 4 }
 0x3ef   :  { %v713_v33 = vadd.f32 %v712_v31, %v711_v29  ;;  %v717_v34 = vadd.f32 %v716_v32, %v709_v30 }
 0x3f1   :  { %v718_v35 = vrot.slane %v717_v34, 2  ;;  %v714_v36 = vrot.slane %v713_v33, 1 }
 0x3f3   :  { %v719_v37 = vadd.f32 %v718_v35, %v717_v34  ;;  %v715_v39 = vadd.f32 %v714_v36, %v713_v33 }
 0x3f5   :  { %v720_v38 = vrot.slane %v719_v37, 1 }
 0x3f7   :  { %v721_v40 = vadd.f32 %v720_v38, %v719_v37 }
 0x3f9   :  { %v748_v41 = vsel %vm747_vm7, %v721_v40, %v715_v39 }
 0x3fa   :  { %1164 = vmatmul.mubr.f32.vlgmr.msra.gmra.mrb[0].mxu1 %v748_v41 }
 0x3fb   :  { %1233 = vmatprep.mubr.msk.f32.mxu1 %vm1494_vm0, %v1493_v0  ;;  %1298 = vmatpush3.bf16.msra.mxu1 %v1297_v46  ;;  %v927_v0 = vld [vmem:[#allocation10 + $0x30] sm:$0xff] }
 0x3fc   :  { %1299 = vmatprep.subr.bf16.mxu1 %v1497_v20  ;;  %v1306_v53 = vpack.c.bf16 %v928_v52, %v927_v0 }
 0x3ff   :  { %1301 = vmatpush3.bf16.msra.mxu1 %v1300_v48 }
 0x400   :  { %1302 = vmatprep.subr.bf16.mxu1 %v1497_v20 }
 0x403   :  { %1304 = vmatpush3.bf16.msra.mxu1 %v1303_v51 }
 0x404   :  { %1305 = vmatprep.subr.bf16.mxu1 %v1497_v20 }
 0x407   :  { %1307 = vmatpush3.bf16.msra.mxu1 %v1306_v53 }
 0x408   :  { %1308 = vmatprep.subr.bf16.mxu1 %v1497_v20 }
 0x40b   :  { %1310 = vmatpush3.bf16.msra.mxu1 %v1309_v56 }
 0x40c   :  { %1311 = vmatprep.subr.bf16.mxu1 %v1497_v20 }
 0x40f   :  { %1313 = vmatpush3.bf16.msra.mxu1 %v1312_v59 }
 0x410   :  { %1314 = vmatprep.subr.bf16.mxu1 %v1497_v20 }
 0x413   :  { %1316 = vmatpush3.bf16.msra.mxu1 %v1315_v1 }
 0x414   :  { %1317 = vmatprep.subr.bf16.mxu1 %v1497_v20 }
 0x417   :  { %1319 = vmatpush3.bf16.msra.mxu1 %v1318_v10 }
 0x4cd   :  { %v816_v3 = vpop.f32.mrb[0].mxu1 }
 0x4ce   :  { %v817_v4 = vadd.f32 %v1044_v2, %v816_v3  ;;  %v1165_v5 = vpop.f32.mrb[1].mxu1 }
 0x4d0   :  { %vm820_vm8 = vcmp.gt.f32.partialorder %v817_v4, 0.0  ;;  %v821_v6 = vmul.f32 0.01, %v817_v4 }
 0x4d2   :  { %v822_v7 = vsel %vm820_vm8, %v817_v4, %v821_v6 }
 0x4d3   :  { %1199 = vmatmul.mubr.f32.vlgmr.msra.gmra.mrb[14].mxu0 %v822_v7 }
 0x5a6   :  { %v914_v20 = vpop.f32.mrb[14].mxu0 }
 0x5a7   :  { %v915_v12 = vadd.f32 %v1046_v11, %v914_v20  ;;  %v1200_v13 = vpop.f32.mrb[15].mxu0 }
 0x5a9   :  { %vm918_vm9 = vcmp.gt.f32.partialorder %v915_v12, 0.0  ;;  %v919_v14 = vmul.f32 0.01, %v915_v12 }
 0x5ab   :  { %v920_v15 = vsel %vm918_vm9, %v915_v12, %v919_v14 }
 0x5ac   :  { %1234 = vmatmul.mubr.f32.vlgmr.msra.gmra.mrb[2].mxu1 %v920_v15 }
 0x67f   :  { %v1010_v17 = vpop.f32.mrb[2].mxu1 }
 0x680   :  { %v1011_v18 = vadd.f32 %v1047_v16, %v1010_v17  ;;  %v1235_v19 = vpop.f32.mrb[3].mxu1 }
 0x682   :  { %1014 = vst [vmem:[#allocation11] sm:$0x3] %v1011_v18 }
 0x683   :  { %1465 = shalt.err (!%p1462_p2)
}
 0x684   :  { %s1466_s17 = scalar_lea.hbm %s1724_s9, 32 }
 0x685   :  { %p1467_p3 = scmp.ne.s32.totalorder %s1724_s9, %s1466_s17  ;;  %p1470_p4 = scmp.lt.u32.totalorder %s1466_s17, %s1724_s9 }
 0x687   :  { %p1472_p5 = pnand %p1470_p4, %p1467_p3 }
 0x689   :  { %1475 = shalt.err (!%p1472_p5)
}
 0x68a   :  { %1024 = dma.vmem_to_hbm [thread:$0]  %s1022_s2, 32, %s1724_s9, [#allocation4]  }
 0x68b   :  { %1482 = dma.done.wait [#allocation4], 32  }
 0x68c   :  { %1483 = vsyncadd [#allocation4], 4294967264 }
 0x68d   :  { %1028 = vsyncpa [#allocation3], 1 }
 0x68e   :  { %1029 = vsyncpa [#allocation6], 1 }
 0x68f   :  { %1030 = vsyncpa [#allocation9], 1 }
 0x690   :  { %1031 = vsyncpa [#allocation4], 1 }

</bundles_post_ra>
